<compile_context>
chip_gen: v5e
topology: v5e:2x2
jax: 0.10.0
libtpu: 0.0.40
codegen_flags: <defaults>
</compile_context>

<pallas_src>
import jax
import jax.numpy as jnp
from jax.experimental import pallas as pl
from jax.experimental.pallas import tpu as pltpu

NEG_INF = -1e30   # used as "-inf" for label-lane padding (avoids inf arithmetic)
LANE = 128        # lane width: labels are padded to this so stores are lane-dense


def _round_up(x, m):
    return ((x + m - 1) // m) * m


# -----------------------------------------------------------------------------
# Fused head kernel (per batch tile):
#   feat_t = relu(pooler  @ Wt + bt)           (TextModel.trans)
#   feat_i = relu(imgfeat @ Wi + bi)           (ImageModel.trans)
#   h      = relu([feat_t|feat_i] @ blockdiag(W1t,W1i) + [b1t|b1i])
#   logits = h @ blockdiag(W2t_pad, W2i_pad) + [b2t_pad | b2i_pad]
#   text_prob = softmax(logits[:, :128]); img_prob = softmax(logits[:, 128:])
#   prob   = softmax(text_prob + img_prob + label_mask)
# -----------------------------------------------------------------------------
def _fused_head_kernel(xt_ref, xi_ref, wt_ref, bt_ref, wi_ref, bi_ref,
                       wc1_ref, bc1_ref, wc2_ref, bc2_ref, mask_ref, prob_ref):
    lp = prob_ref.shape[1]   # lane-padded label width (= LANE)

    def softmax_rows(z):     # f32 rows; EUP recip
        m = jnp.max(z, axis=1, keepdims=True)
        e = jnp.exp(z - m)
        return e * pl.reciprocal(jnp.sum(e, axis=1, keepdims=True), approx=True)

    # Separate trans dots (Dropout is identity in eval mode). No zero-padded
    # block-diagonal for the largest weight -> half the DMA / VMEM / MXU work.
    feat_t = jnp.maximum(
        jnp.dot(xt_ref[...], wt_ref[...], preferred_element_type=jnp.float32)
        + bt_ref[...], 0.0)
    feat_i = jnp.maximum(
        jnp.dot(xi_ref[...], wi_ref[...], preferred_element_type=jnp.float32)
        + bi_ref[...], 0.0)
    feat = jnp.concatenate([feat_t, feat_i], axis=1).astype(wc1_ref.dtype)

    # Fused classifier hidden layers (block-diagonal text|image).
    h = jnp.maximum(
        jnp.dot(feat, wc1_ref[...], preferred_element_type=jnp.float32)
        + bc1_ref[...], 0.0)

    # Fused classifier output layers; columns [0:lp) = text logits (lane-padded
    # with -inf bias), [lp:2*lp) = image logits.
    logits = (jnp.dot(h.astype(wc2_ref.dtype), wc2_ref[...],
                      preferred_element_type=jnp.float32) + bc2_ref[...])

    text_prob = softmax_rows(logits[:, :lp])   # padded lanes -> exactly 0
    img_prob = softmax_rows(logits[:, lp:])    # padded lanes -> exactly 0

    # Precomputed additive mask (0 on valid labels, NEG_INF on padding).
    combined = text_prob + img_prob + mask_ref[...]
    prob_ref[...] = softmax_rows(combined)     # padded lanes -> exactly 0


# -----------------------------------------------------------------------------
# One-time weight fusion (hoisted out of the per-call forward path).
# -----------------------------------------------------------------------------
def prepare_head_params(params):
    lp = LANE
    num_labels = params["wtc2"].shape[1]

    def block_diag(a, b):
        m, n = a.shape
        p, q = b.shape
        top = jnp.concatenate([a, jnp.zeros((m, q), a.dtype)], axis=1)
        bot = jnp.concatenate([jnp.zeros((p, n), b.dtype), b], axis=1)
        return jnp.concatenate([top, bot], axis=0)

    def pad_label_w(w):   # (OH, L) -> (OH, lp), zero-padded columns
        return jnp.pad(w, ((0, 0), (0, lp - w.shape[1])))

    def pad_label_b(b):   # (1, L) -> (1, lp), -inf in padded columns
        return jnp.pad(b, ((0, 0), (0, lp - b.shape[1])), constant_values=NEG_INF)

    label_mask = jnp.where(jnp.arange(lp)[None, :] < num_labels,
                           0.0, NEG_INF).astype(jnp.float32)

    return {
        "wt": params["wt"].astype(jnp.bfloat16),
        "bt": params["bt"].astype(jnp.float32),
        "wi": params["wi"].astype(jnp.bfloat16),
        "bi": params["bi"].astype(jnp.float32),
        "wc1": block_diag(params["wtc1"], params["wic1"]).astype(jnp.bfloat16),
        "bc1": jnp.concatenate([params["btc1"], params["bic1"]], axis=1)
               .astype(jnp.float32),
        "wc2": block_diag(pad_label_w(params["wtc2"]),
                          pad_label_w(params["wic2"])).astype(jnp.bfloat16),
        "bc2": jnp.concatenate([pad_label_b(params["btc2"]),
                                pad_label_b(params["bic2"])], axis=1)
               .astype(jnp.float32),
        "label_mask": label_mask,
        "num_labels": num_labels,
    }


def fused_head(pooler, imgfeat, head):
    """Runs the fused multimodal head. Returns (prob (B, L) f32, pred (B,) i32)."""
    lp = LANE
    num_labels = head["num_labels"]
    b = pooler.shape[0]

    # ---- batch tiling ---------------------------------------------------------
    # B <= 128: single grid step (zero per-step overhead, MXU rows well filled).
    # B  > 128: 128-row tiles, padded to an even step count so the "parallel"
    #           batch axis shards across both TensorCores on v7x.
    if b <= 128:
        tile_b = _round_up(b, 16)          # 16 = bf16 sublane packing
        b_pad = tile_b
    else:
        tile_b = 128
        b_pad = _round_up(b, 2 * tile_b)

    xt = pooler.astype(jnp.bfloat16)
    xi = imgfeat.astype(jnp.bfloat16)
    if b_pad != b:
        xt = jnp.pad(xt, ((0, b_pad - b), (0, 0)))
        xi = jnp.pad(xi, ((0, b_pad - b), (0, 0)))
    bh = xt.shape[1]
    rf = xi.shape[1]

    const_map = lambda i: (0, 0)  # weights stay VMEM-resident across grid steps

    def wspec(arr):               # fetched once -> no double-buffer
        return pl.BlockSpec(arr.shape, const_map, pipeline_mode=pl.Buffered(1))

    grid_spec = pltpu.PrefetchScalarGridSpec(
        num_scalar_prefetch=0,
        grid=(b_pad // tile_b,),
        in_specs=[
            pl.BlockSpec((tile_b, bh), lambda i: (i, 0)),   # pooler tile
            pl.BlockSpec((tile_b, rf), lambda i: (i, 0)),   # imgfeat tile
            wspec(head["wt"]), wspec(head["bt"]),
            wspec(head["wi"]), wspec(head["bi"]),
            wspec(head["wc1"]), wspec(head["bc1"]),
            wspec(head["wc2"]), wspec(head["bc2"]),
            wspec(head["label_mask"]),
        ],
        out_specs=pl.BlockSpec((tile_b, lp), lambda i: (i, 0)),
    )

    prob_pad = pl.pallas_call(
        _fused_head_kernel,
        out_shape=jax.ShapeDtypeStruct((b_pad, lp), jnp.float32),
        grid_spec=grid_spec,
        compiler_params=pltpu.CompilerParams(
            dimension_semantics=("parallel",),
            # Safe explicit budget on v5e/v6e/v7x; with Buffered(1) weights are
            # resident once per core, activations double-buffered.
            vmem_limit_bytes=32 * 1024 * 1024),
    )(xt, xi, head["wt"], head["bt"], head["wi"], head["bi"],
      head["wc1"], head["bc1"], head["wc2"], head["bc2"], head["label_mask"])

    prob = prob_pad[:b, :num_labels]
    pred = jnp.argmax(prob, axis=1).astype(jnp.int32)   # few elems/row: wrapper-side
    return prob, pred


# -----------------------------------------------------------------------------
# Backbone stand-ins (plain JAX glue)
# -----------------------------------------------------------------------------
# TODO(synk): pretrained BERT replaced by embedding + masked mean-pool + tanh dense
#             (same output shape/semantics as bert(...)["pooler_output"]).
def text_backbone(texts, texts_mask, emb_table, w_pool, b_pool):
    emb = emb_table[texts]                                    # (B, S, Hb)
    m = texts_mask.astype(jnp.float32)[..., None]             # (B, S, 1)
    pooled = jnp.sum(emb * m, axis=1) / jnp.maximum(jnp.sum(m, axis=1), 1.0)
    return jnp.tanh(pooled @ w_pool + b_pool)                 # (B, Hb)


# TODO(synk): pretrained ResNet50 feature extractor replaced by global average
#             pooling over H,W followed by a linear projection + ReLU
#             (same output shape/semantics as Sequential(resnet[:-1], Flatten)).
def image_backbone(imgs, w_img, b_img):
    gap = jnp.mean(imgs, axis=(2, 3))                         # (B, C)  [imgs NCHW]
    return jnp.maximum(gap @ w_img + b_img, 0.0)              # (B, RESNET_FEAT)


# CrossEntropyLoss(weight=...) on prob_vec (PyTorch applies log_softmax internally)
def weighted_cross_entropy(prob_vec, labels, class_weight):
    logp = prob_vec - jax.nn.logsumexp(prob_vec, axis=1, keepdims=True)
    picked = jnp.take_along_axis(logp, labels[:, None], axis=1)[:, 0]
    w = class_weight[labels]
    return -jnp.sum(w * picked) / jnp.sum(w)


# TODO(synk): if batch stays tiny, the two backbone projection dots could also be
# folded into the fused_head pallas_call; kept separate here for clarity.
def model_forward(texts, texts_mask, imgs, params, head_params, labels=None):
    pooler = text_backbone(texts, texts_mask,
                           params["emb_table"], params["w_pool"], params["b_pool"])
    imgfeat = image_backbone(imgs, params["w_img_backbone"], params["b_img_backbone"])
    prob_vec, pred_labels = fused_head(pooler, imgfeat, head_params)
    if labels is not None:
        loss = weighted_cross_entropy(prob_vec, labels, params["loss_weight"])
        return pred_labels, loss
    return pred_labels


# -----------------------------------------------------------------------------
# Deterministic parameter construction
# -----------------------------------------------------------------------------
def make_params(key, *, vocab, bert_hidden, resnet_feat, middle_hidden,
                out_hidden, num_labels, img_channels):
    keys = jax.random.split(key, 16)

    def init(k, shape, scale=0.1):
        return (scale * jax.random.normal(k, shape)).astype(jnp.float32)

    return {
        # text backbone stand-in
        "emb_table": init(keys[0], (vocab, bert_hidden)),
        "w_pool": init(keys[1], (bert_hidden, bert_hidden)),
        "b_pool": jnp.zeros((bert_hidden,), jnp.float32),
        # image backbone stand-in
        "w_img_backbone": init(keys[2], (img_channels, resnet_feat)),
        "b_img_backbone": jnp.zeros((resnet_feat,), jnp.float32),
        # TextModel.trans / ImageModel.trans
        "wt": init(keys[3], (bert_hidden, middle_hidden)),
        "bt": init(keys[4], (1, middle_hidden)),
        "wi": init(keys[5], (resnet_feat, middle_hidden)),
        "bi": init(keys[6], (1, middle_hidden)),
        # text_classifier
        "wtc1": init(keys[7], (middle_hidden, out_hidden)),
        "btc1": init(keys[8], (1, out_hidden)),
        "wtc2": init(keys[9], (out_hidden, num_labels)),
        "btc2": init(keys[10], (1, num_labels)),
        # img_classifier
        "wic1": init(keys[11], (middle_hidden, out_hidden)),
        "bic1": init(keys[12], (1, out_hidden)),
        "wic2": init(keys[13], (out_hidden, num_labels)),
        "bic2": init(keys[14], (1, num_labels)),
        # loss weight
        "loss_weight": jnp.array([1.0, 2.0, 1.5, 0.5][:num_labels], jnp.float32),
    }


if __name__ == "__main__":
    # small config
    B, S = 16, 8
    VOCAB = 50
    BERT_HIDDEN = 32
    RESNET_FEAT = 64        # stands in for resnet50 fc.in_features (2048)
    MIDDLE_HIDDEN = 32      # config.middle_hidden_size
    OUT_HIDDEN = 32         # config.out_hidden_size
    NUM_LABELS = 4          # config.num_labels
    C, H, W = 3, 16, 16     # imgs NCHW

    key = jax.random.PRNGKey(0)
    k_par, k_txt, k_msk, k_img, k_lbl = jax.random.split(key, 5)

    params = make_params(k_par, vocab=VOCAB, bert_hidden=BERT_HIDDEN,
                         resnet_feat=RESNET_FEAT, middle_hidden=MIDDLE_HIDDEN,
                         out_hidden=OUT_HIDDEN, num_labels=NUM_LABELS,
                         img_channels=C)

    # One-time head-weight fusion (hoisted out of the per-call forward path).
    head_params = jax.tree_util.tree_map(
        jax.block_until_ready,
        prepare_head_params(params))

    texts = jax.random.randint(k_txt, (B, S), 0, VOCAB, dtype=jnp.int32)
    texts_mask = jnp.ones((B, S), jnp.int32).at[:, S - 2:].set(0)
    imgs = jax.random.normal(k_img, (B, C, H, W), jnp.float32)
    labels = jax.random.randint(k_lbl, (B,), 0, NUM_LABELS, dtype=jnp.int32)

    pred_labels, loss = model_forward(texts, texts_mask, imgs, params,
                                      head_params, labels)
    pred_labels = jax.block_until_ready(pred_labels)
    loss = jax.block_until_ready(loss)

    assert pred_labels.shape == (B,)
    assert pred_labels.dtype == jnp.int32
    assert bool(jnp.all((pred_labels >= 0) & (pred_labels < NUM_LABELS)))
    assert jnp.isfinite(loss)
    print("KERNEL_OK")
</pallas_src>

<mosaic_0001>
module attributes {stable_mosaic.version = 11 : i64} {
  func.func @_fused_head_kernel(%arg0: i32, %arg1: memref<16x32xbf16, #tpu.memory_space<vmem>>, %arg2: memref<16x64xbf16, #tpu.memory_space<vmem>>, %arg3: memref<32x32xbf16, #tpu.memory_space<vmem>>, %arg4: memref<1x32xf32, #tpu.memory_space<vmem>>, %arg5: memref<64x32xbf16, #tpu.memory_space<vmem>>, %arg6: memref<1x32xf32, #tpu.memory_space<vmem>>, %arg7: memref<64x64xbf16, #tpu.memory_space<vmem>>, %arg8: memref<1x64xf32, #tpu.memory_space<vmem>>, %arg9: memref<64x256xbf16, #tpu.memory_space<vmem>>, %arg10: memref<1x256xf32, #tpu.memory_space<vmem>>, %arg11: memref<1x128xf32, #tpu.memory_space<vmem>>, %arg12: memref<16x128xf32, #tpu.memory_space<vmem>>) attributes {dimension_semantics = [#tpu.dimension_semantics<parallel>], iteration_bounds = array<i64: 1>, scalar_prefetch = 0 : i64, scratch_operands = 0 : i64, tpu.core_type = #tpu.core_type<tc>, window_params = [{transform_indices = @transform_0, window_bounds = array<i64: 16, 32>}, {transform_indices = @transform_1, window_bounds = array<i64: 16, 64>}, {pipeline_mode = #tpu.pipeline_mode<synchronous>, transform_indices = @transform_2, window_bounds = array<i64: 32, 32>}, {pipeline_mode = #tpu.pipeline_mode<synchronous>, transform_indices = @transform_3, window_bounds = array<i64: 1, 32>}, {pipeline_mode = #tpu.pipeline_mode<synchronous>, transform_indices = @transform_4, window_bounds = array<i64: 64, 32>}, {pipeline_mode = #tpu.pipeline_mode<synchronous>, transform_indices = @transform_5, window_bounds = array<i64: 1, 32>}, {pipeline_mode = #tpu.pipeline_mode<synchronous>, transform_indices = @transform_6, window_bounds = array<i64: 64, 64>}, {pipeline_mode = #tpu.pipeline_mode<synchronous>, transform_indices = @transform_7, window_bounds = array<i64: 1, 64>}, {pipeline_mode = #tpu.pipeline_mode<synchronous>, transform_indices = @transform_8, window_bounds = array<i64: 64, 256>}, {pipeline_mode = #tpu.pipeline_mode<synchronous>, transform_indices = @transform_9, window_bounds = array<i64: 1, 256>}, {pipeline_mode = #tpu.pipeline_mode<synchronous>, transform_indices = @transform_10, window_bounds = array<i64: 1, 128>}, {transform_indices = @transform_11, window_bounds = array<i64: 16, 128>}]} {
    %c0 = arith.constant 0 : index
    %c0_0 = arith.constant 0 : index
    %0 = vector.load %arg1[%c0, %c0_0] : memref<16x32xbf16, #tpu.memory_space<vmem>>, vector<16x32xbf16>
    %c0_1 = arith.constant 0 : index
    %c0_2 = arith.constant 0 : index
    %1 = vector.load %arg3[%c0_1, %c0_2] : memref<32x32xbf16, #tpu.memory_space<vmem>>, vector<32x32xbf16>
    %cst = arith.constant dense<0.000000e+00> : vector<16x32xf32>
    %2 = tpu.matmul %0, %1, %cst {dimension_numbers = #tpu.dot_dimension_numbers<[1], [0], [0], [1], [0, 0, 1, 1], [], []>} : vector<16x32xbf16>, vector<32x32xbf16>, vector<16x32xf32> -> vector<16x32xf32>
    %c0_3 = arith.constant 0 : index
    %c0_4 = arith.constant 0 : index
    %3 = vector.load %arg4[%c0_3, %c0_4] : memref<1x32xf32, #tpu.memory_space<vmem>>, vector<1x32xf32>
    %4 = vector.broadcast %3 : vector<1x32xf32> to vector<16x32xf32>
    %5 = arith.addf %2, %4 : vector<16x32xf32>
    %cst_5 = arith.constant 0.000000e+00 : f32
    %6 = vector.broadcast %cst_5 : f32 to vector<16x32xf32>
    %7 = arith.maximumf %5, %6 : vector<16x32xf32>
    %c0_6 = arith.constant 0 : index
    %c0_7 = arith.constant 0 : index
    %8 = vector.load %arg2[%c0_6, %c0_7] : memref<16x64xbf16, #tpu.memory_space<vmem>>, vector<16x64xbf16>
    %c0_8 = arith.constant 0 : index
    %c0_9 = arith.constant 0 : index
    %9 = vector.load %arg5[%c0_8, %c0_9] : memref<64x32xbf16, #tpu.memory_space<vmem>>, vector<64x32xbf16>
    %cst_10 = arith.constant dense<0.000000e+00> : vector<16x32xf32>
    %10 = tpu.matmul %8, %9, %cst_10 {dimension_numbers = #tpu.dot_dimension_numbers<[1], [0], [0], [1], [0, 0, 1, 1], [], []>} : vector<16x64xbf16>, vector<64x32xbf16>, vector<16x32xf32> -> vector<16x32xf32>
    %c0_11 = arith.constant 0 : index
    %c0_12 = arith.constant 0 : index
    %11 = vector.load %arg6[%c0_11, %c0_12] : memref<1x32xf32, #tpu.memory_space<vmem>>, vector<1x32xf32>
    %12 = vector.broadcast %11 : vector<1x32xf32> to vector<16x32xf32>
    %13 = arith.addf %10, %12 : vector<16x32xf32>
    %cst_13 = arith.constant 0.000000e+00 : f32
    %14 = vector.broadcast %cst_13 : f32 to vector<16x32xf32>
    %15 = arith.maximumf %13, %14 : vector<16x32xf32>
    %16 = tpu.concatenate %7, %15 in 1 : vector<16x32xf32>, vector<16x32xf32> -> vector<16x64xf32>
    %17 = arith.truncf %16 : vector<16x64xf32> to vector<16x64xbf16>
    %c0_14 = arith.constant 0 : index
    %c0_15 = arith.constant 0 : index
    %18 = vector.load %arg7[%c0_14, %c0_15] : memref<64x64xbf16, #tpu.memory_space<vmem>>, vector<64x64xbf16>
    %cst_16 = arith.constant dense<0.000000e+00> : vector<16x64xf32>
    %19 = tpu.matmul %17, %18, %cst_16 {dimension_numbers = #tpu.dot_dimension_numbers<[1], [0], [0], [1], [0, 0, 1, 1], [], []>} : vector<16x64xbf16>, vector<64x64xbf16>, vector<16x64xf32> -> vector<16x64xf32>
    %c0_17 = arith.constant 0 : index
    %c0_18 = arith.constant 0 : index
    %20 = vector.load %arg8[%c0_17, %c0_18] : memref<1x64xf32, #tpu.memory_space<vmem>>, vector<1x64xf32>
    %21 = vector.broadcast %20 : vector<1x64xf32> to vector<16x64xf32>
    %22 = arith.addf %19, %21 : vector<16x64xf32>
    %cst_19 = arith.constant 0.000000e+00 : f32
    %23 = vector.broadcast %cst_19 : f32 to vector<16x64xf32>
    %24 = arith.maximumf %22, %23 : vector<16x64xf32>
    %25 = arith.truncf %24 : vector<16x64xf32> to vector<16x64xbf16>
    %c0_20 = arith.constant 0 : index
    %c0_21 = arith.constant 0 : index
    %26 = vector.load %arg9[%c0_20, %c0_21] : memref<64x256xbf16, #tpu.memory_space<vmem>>, vector<64x256xbf16>
    %cst_22 = arith.constant dense<0.000000e+00> : vector<16x256xf32>
    %27 = tpu.matmul %25, %26, %cst_22 {dimension_numbers = #tpu.dot_dimension_numbers<[1], [0], [0], [1], [0, 0, 1, 1], [], []>} : vector<16x64xbf16>, vector<64x256xbf16>, vector<16x256xf32> -> vector<16x256xf32>
    %c0_23 = arith.constant 0 : index
    %c0_24 = arith.constant 0 : index
    %28 = vector.load %arg10[%c0_23, %c0_24] : memref<1x256xf32, #tpu.memory_space<vmem>>, vector<1x256xf32>
    %29 = vector.broadcast %28 : vector<1x256xf32> to vector<16x256xf32>
    %30 = arith.addf %27, %29 : vector<16x256xf32>
    %31 = vector.extract_strided_slice %30 {offsets = [0, 0], sizes = [16, 128], strides = [1, 1]} : vector<16x256xf32> to vector<16x128xf32>
    %cst_25 = arith.constant dense<0xFF800000> : vector<16xf32>
    %32 = vector.multi_reduction <maximumf>, %31, %cst_25 [1] : vector<16x128xf32> to vector<16xf32>
    %33 = vector.shape_cast %32 : vector<16xf32> to vector<16x1xf32>
    %34 = vector.broadcast %33 : vector<16x1xf32> to vector<16x128xf32>
    %35 = arith.subf %31, %34 : vector<16x128xf32>
    %36 = math.exp %35 : vector<16x128xf32>
    %cst_26 = arith.constant dense<0.000000e+00> : vector<16xf32>
    %37 = vector.multi_reduction <add>, %36, %cst_26 [1] : vector<16x128xf32> to vector<16xf32>
    %38 = vector.shape_cast %37 : vector<16xf32> to vector<16x1xf32>
    %39 = tpu.reciprocal %38 {approx = true} : vector<16x1xf32> -> vector<16x1xf32>
    %40 = vector.broadcast %39 : vector<16x1xf32> to vector<16x128xf32>
    %41 = arith.mulf %36, %40 : vector<16x128xf32>
    %42 = vector.extract_strided_slice %30 {offsets = [0, 128], sizes = [16, 128], strides = [1, 1]} : vector<16x256xf32> to vector<16x128xf32>
    %cst_27 = arith.constant dense<0xFF800000> : vector<16xf32>
    %43 = vector.multi_reduction <maximumf>, %42, %cst_27 [1] : vector<16x128xf32> to vector<16xf32>
    %44 = vector.shape_cast %43 : vector<16xf32> to vector<16x1xf32>
    %45 = vector.broadcast %44 : vector<16x1xf32> to vector<16x128xf32>
    %46 = arith.subf %42, %45 : vector<16x128xf32>
    %47 = math.exp %46 : vector<16x128xf32>
    %cst_28 = arith.constant dense<0.000000e+00> : vector<16xf32>
    %48 = vector.multi_reduction <add>, %47, %cst_28 [1] : vector<16x128xf32> to vector<16xf32>
    %49 = vector.shape_cast %48 : vector<16xf32> to vector<16x1xf32>
    %50 = tpu.reciprocal %49 {approx = true} : vector<16x1xf32> -> vector<16x1xf32>
    %51 = vector.broadcast %50 : vector<16x1xf32> to vector<16x128xf32>
    %52 = arith.mulf %47, %51 : vector<16x128xf32>
    %53 = arith.addf %41, %52 : vector<16x128xf32>
    %c0_29 = arith.constant 0 : index
    %c0_30 = arith.constant 0 : index
    %54 = vector.load %arg11[%c0_29, %c0_30] : memref<1x128xf32, #tpu.memory_space<vmem>>, vector<1x128xf32>
    %55 = vector.broadcast %54 : vector<1x128xf32> to vector<16x128xf32>
    %56 = arith.addf %53, %55 : vector<16x128xf32>
    %cst_31 = arith.constant dense<0xFF800000> : vector<16xf32>
    %57 = vector.multi_reduction <maximumf>, %56, %cst_31 [1] : vector<16x128xf32> to vector<16xf32>
    %58 = vector.shape_cast %57 : vector<16xf32> to vector<16x1xf32>
    %59 = vector.broadcast %58 : vector<16x1xf32> to vector<16x128xf32>
    %60 = arith.subf %56, %59 : vector<16x128xf32>
    %61 = math.exp %60 : vector<16x128xf32>
    %cst_32 = arith.constant dense<0.000000e+00> : vector<16xf32>
    %62 = vector.multi_reduction <add>, %61, %cst_32 [1] : vector<16x128xf32> to vector<16xf32>
    %63 = vector.shape_cast %62 : vector<16xf32> to vector<16x1xf32>
    %64 = tpu.reciprocal %63 {approx = true} : vector<16x1xf32> -> vector<16x1xf32>
    %65 = vector.broadcast %64 : vector<16x1xf32> to vector<16x128xf32>
    %66 = arith.mulf %61, %65 : vector<16x128xf32>
    %c0_33 = arith.constant 0 : index
    %c0_34 = arith.constant 0 : index
    %67 = vector.load %arg12[%c0_33, %c0_34] : memref<16x128xf32, #tpu.memory_space<vmem>>, vector<16x128xf32>
    tpu.vector_store %arg12[%c0_33, %c0_34], %66 {strides = array<i32>} : memref<16x128xf32, #tpu.memory_space<vmem>>, vector<16x128xf32>,
    return
  }
  func.func @transform_0(%arg0: i32) -> (i32, i32) {
    %c0_i32 = arith.constant 0 : i32
    %c0_i32_0 = arith.constant 0 : i32
    return %arg0, %c0_i32 : i32, i32
  }
  func.func @transform_1(%arg0: i32) -> (i32, i32) {
    %c0_i32 = arith.constant 0 : i32
    %c0_i32_0 = arith.constant 0 : i32
    return %arg0, %c0_i32 : i32, i32
  }
  func.func @transform_2(%arg0: i32) -> (i32, i32) {
    %c0_i32 = arith.constant 0 : i32
    %c0_i32_0 = arith.constant 0 : i32
    %c0_i32_1 = arith.constant 0 : i32
    return %c0_i32, %c0_i32_0 : i32, i32
  }
  func.func @transform_3(%arg0: i32) -> (i32, i32) {
    %c0_i32 = arith.constant 0 : i32
    %c0_i32_0 = arith.constant 0 : i32
    %c0_i32_1 = arith.constant 0 : i32
    return %c0_i32, %c0_i32_0 : i32, i32
  }
  func.func @transform_4(%arg0: i32) -> (i32, i32) {
    %c0_i32 = arith.constant 0 : i32
    %c0_i32_0 = arith.constant 0 : i32
    %c0_i32_1 = arith.constant 0 : i32
    return %c0_i32, %c0_i32_0 : i32, i32
  }
  func.func @transform_5(%arg0: i32) -> (i32, i32) {
    %c0_i32 = arith.constant 0 : i32
    %c0_i32_0 = arith.constant 0 : i32
    %c0_i32_1 = arith.constant 0 : i32
    return %c0_i32, %c0_i32_0 : i32, i32
  }
  func.func @transform_6(%arg0: i32) -> (i32, i32) {
    %c0_i32 = arith.constant 0 : i32
    %c0_i32_0 = arith.constant 0 : i32
    %c0_i32_1 = arith.constant 0 : i32
    return %c0_i32, %c0_i32_0 : i32, i32
  }
  func.func @transform_7(%arg0: i32) -> (i32, i32) {
    %c0_i32 = arith.constant 0 : i32
    %c0_i32_0 = arith.constant 0 : i32
    %c0_i32_1 = arith.constant 0 : i32
    return %c0_i32, %c0_i32_0 : i32, i32
  }
  func.func @transform_8(%arg0: i32) -> (i32, i32) {
    %c0_i32 = arith.constant 0 : i32
    %c0_i32_0 = arith.constant 0 : i32
    %c0_i32_1 = arith.constant 0 : i32
    return %c0_i32, %c0_i32_0 : i32, i32
  }
  func.func @transform_9(%arg0: i32) -> (i32, i32) {
    %c0_i32 = arith.constant 0 : i32
    %c0_i32_0 = arith.constant 0 : i32
    %c0_i32_1 = arith.constant 0 : i32
    return %c0_i32, %c0_i32_0 : i32, i32
  }
  func.func @transform_10(%arg0: i32) -> (i32, i32) {
    %c0_i32 = arith.constant 0 : i32
    %c0_i32_0 = arith.constant 0 : i32
    %c0_i32_1 = arith.constant 0 : i32
    return %c0_i32, %c0_i32_0 : i32, i32
  }
  func.func @transform_11(%arg0: i32) -> (i32, i32) {
    %c0_i32 = arith.constant 0 : i32
    %c0_i32_0 = arith.constant 0 : i32
    return %arg0, %c0_i32 : i32, i32
  }
}

</mosaic_0001>

<bundles_post_ra>
// kernel: tpu_custom_call.1
= control target key start
LH: loop header
LB: loop body
LE: loop exit
PB: predicated region body
PF: predicated region fallthrough
CT: control target
= control target key end

     0   :  { %16 = vsyncpa [#allocation3], 0  ;;  %s821_s0 = inlined_call_operand.hbm [shape: bf16[16,32], index: 0, kind: input, shape index: {}]   ;;  %s822_s1 = inlined_call_operand.hbm [shape: bf16[16,64], index: 1, kind: input, shape index: {}]   ;;  %s823_s2 = inlined_call_operand.vmem [shape: bf16[32,32], index: 2, kind: input, shape index: {}]   ;;  %s824_s3 = inlined_call_operand.vmem [shape: f32[1,32], index: 3, kind: input, shape index: {}]   ;;  %s825_s4 = inlined_call_operand.vmem [shape: bf16[64,32], index: 4, kind: input, shape index: {}]   ;;  %s826_s5 = inlined_call_operand.vmem [shape: f32[1,32], index: 5, kind: input, shape index: {}]   ;;  %s827_s6 = inlined_call_operand.vmem [shape: bf16[64,64], index: 6, kind: input, shape index: {}]   ;;  %s828_s7 = inlined_call_operand.vmem [shape: f32[1,64], index: 7, kind: input, shape index: {}]   ;;  %s829_s8 = inlined_call_operand.hbm [shape: bf16[64,256], index: 8, kind: input, shape index: {}]   ;;  %s830_s9 = inlined_call_operand.vmem [shape: f32[1,256], index: 9, kind: input, shape index: {}]   ;;  %s831_s10 = inlined_call_operand.vmem [shape: f32[1,128], index: 10, kind: input, shape index: {}]   ;;  %s832_s11 = inlined_call_operand.hbm [shape: f32[16,128], index: 11, kind: output, shape index: {}]  }
   0x1   :  { %17 = vsyncpa [#allocation6], 0 }
   0x2   :  { %18 = vsyncpa [#allocation4], 0  ;;  %s36_s19 = sshll.u32 %s822_s1, 4  ;;  %s682_s20 = smov [#allocation5]   ;;  %s37_s19 = int_to_ptr.hbm [resolvable:$true] %s36_s19 }
   0x3   :  { %s38_s21 = sshll.u32 %s682_s20, 4  ;;  %s23_s24 = sshll.u32 %s821_s0, 4  ;;  %s39_s21 = int_to_ptr.vmem [resolvable:$true] %s38_s21  ;;  %s24_s24 = int_to_ptr.hbm [resolvable:$true] %s23_s24 }
   0x4   :  { %s683_s25 = smov 64   ;;  %s684_s26 = smov 4  }
   0x5   :  { %44 = dma.hbm_to_vmem [thread:$0]  %s37_s19, 128, %s39_s21, [#allocation6], %s683_s25, %s683_s25, %s684_s26  }
   0x6   :  { %s685_s27 = smov [#allocation2]   ;;  %s61_s12 = sshll.u32 %s829_s8, 4  ;;  %s62_s12 = int_to_ptr.hbm [resolvable:$true] %s61_s12 }
   0x7   :  { %s25_s28 = sshll.u32 %s685_s27, 4  ;;  %s686_s1 = smov [#allocation7]   ;;  %s26_s28 = int_to_ptr.vmem [resolvable:$true] %s25_s28 }
   0x8   :  { %31 = dma.hbm_to_vmem [thread:$0]  %s24_s24, 128, %s26_s28, [#allocation3], %s683_s25, %s683_s25, %s684_s26  }
   0x9   :  { %s63_s13 = sshll.u32 %s686_s1, 4  ;;  %s687_s14 = smov 128   ;;  %s64_s13 = int_to_ptr.vmem [resolvable:$true] %s63_s13 }
   0xa   :  { %s688_s15 = smov 8  }
   0xb   :  { %69 = dma.hbm_to_vmem [thread:$0]  %s62_s12, 1024, %s64_s13, [#allocation6], %s687_s14, %s687_s14, %s688_s15  }
   0xc   :  { %676 = dma.done.wait [#allocation3], 128  }
   0xd   :  { %677 = vsyncadd [#allocation3], 4294967168 }
   0xe   :  { %678 = dma.done.wait [#allocation6], 1152  }
   0xf   :  { %679 = vsyncadd [#allocation6], 4294966144  ;;  %v525_v0 = vld [vmem:[%s825_s4 + $0x18] sm:$0xff]  ;;  %v520_v1 = vld [vmem:[%s823_s2 + $0x8] sm:$0xff]  ;;  %vm114_vm0 = vcmask 261120   ;;  %vm177_vm1 = vcmask 523264  }
  0x10   :  { %185 = vmatpush.bf16.msra.mxu1 %v525_v0  ;;  %v524_v2 = vld [vmem:[%s825_s4 + $0x10] sm:$0xff]  ;;  %124 = vmatpush.bf16.msra.mxu0 %v520_v1  ;;  %v519_v3 = vld [vmem:[%s823_s2] sm:$0xff]  ;;  %v523_v4 = vld [vmem:[%s825_s4 + $0x8] sm:$0xff]  ;;  %s689_s1 = smov 32   ;;  %s419_s21 = sshll.u32 %s832_s11, 4  ;;  %s420_s21 = int_to_ptr.hbm [resolvable:$true] %s419_s21 }
  0x11   :  { %v518_v5 = vld [vmem:[#allocation2] sm:$0xff]  ;;  %v521_v7 = vld [vmem:[#allocation5] sm:$0xff]  ;;  %v529_v8 = vld [vmem:[%s827_s6 + $0x18] sm:$0xff] }
  0x12   :  { %v522_v6 = vld [vmem:[%s825_s4] sm:$0xff]  ;;  %251 = vmatpush.bf16.msra.mxu2 %v529_v8  ;;  %v528_v9 = vld [vmem:[%s827_s6 + $0x10] sm:$0xff]  ;;  %v527_v10 = vld [vmem:[%s827_s6 + $0x8] sm:$0xff] }
  0x13   :  { %v552_v12 = vld [vmem:[%s826_s5] ss:$0 sm:$0xff]  ;;  %v537_v34 = vld [vmem:[#allocation7 + $0x34] sm:$0xf0]  ;;  %v536_v35 = vld [vmem:[#allocation7 + $0x34] sm:$0xf] }
  0x14   :  { %186 = vmatpush.bf16.msra.mxu1 %v524_v2  ;;  %125 = vmatpush.bf16.msra.mxu0 %v519_v3  ;;  %v526_v19 = vld [vmem:[%s827_s6] sm:$0xff]  ;;  %v512_v37 = vld [vmem:[#allocation7 + $0x38] sm:$0xf0]  ;;  %v502_v39 = vld [vmem:[#allocation7 + $0x20] sm:$0xf] }
  0x15   :  { %v553_v21 = vld [vmem:[%s824_s3] ss:$0 sm:$0xff]  ;;  %v515_v38 = vor.u32 %v536_v35, %v512_v37  ;;  %v535_v40 = vld [vmem:[#allocation7 + $0x24] sm:$0xf0]  ;;  %v534_v41 = vld [vmem:[#allocation7 + $0x24] sm:$0xf] }
  0x16   :  { %252 = vmatpush.bf16.msra.mxu2 %v528_v9  ;;  %v510_v33 = vld [vmem:[#allocation7 + $0x30] sm:$0xf]  ;;  %v503_v42 = vor.u32 %v535_v40, %v502_v39  ;;  %v504_v43 = vld [vmem:[#allocation7 + $0x28] sm:$0xf0]  ;;  %v533_v46 = vld [vmem:[#allocation7 + $0x14] sm:$0xf0] }
  0x17   :  { %445 = vmatmul.msk.bf16.vlgmr.msra.gmra.mxu0 %vm114_vm0, %v518_v5  ;;  %v511_v36 = vor.u32 %v537_v34, %v510_v33  ;;  %v507_v44 = vor.u32 %v534_v41, %v504_v43  ;;  %v494_v45 = vld [vmem:[#allocation7 + $0x10] sm:$0xf]  ;;  %v532_v47 = vld [vmem:[#allocation7 + $0x14] sm:$0xf]  ;;  %v496_v49 = vld [vmem:[#allocation7 + $0x18] sm:$0xf0] }
  0x18   :  { %187 = vmatpush.bf16.msra.mxu1 %v523_v4  ;;  %339 = vmatpush.bf16.msrb.mxu0 %v515_v38  ;;  %v495_v48 = vor.u32 %v533_v46, %v494_v45  ;;  %v499_v50 = vor.u32 %v532_v47, %v496_v49  ;;  %v486_v51 = vld [vmem:[#allocation7] sm:$0xf]  ;;  %v531_v52 = vld [vmem:[#allocation7 + $0x4] sm:$0xf0]  ;;  %v530_v53 = vld [vmem:[#allocation7 + $0x4] sm:$0xf] }
  0x19   :  { %325 = vmatpush.bf16.msra.mxu3 %v511_v36  ;;  %v487_v54 = vor.u32 %v531_v52, %v486_v51  ;;  %v488_v55 = vld [vmem:[#allocation7 + $0x8] sm:$0xf0]  ;;  %v554_v58 = vld [vmem:[%s828_s7] ss:$0 sm:$0xff] }
  0x1a   :  { %253 = vmatpush.bf16.msra.mxu2 %v527_v10  ;;  %v491_v56 = vor.u32 %v530_v53, %v488_v55  ;;  %v272_v2 = vld [vmem:[%s830_s9] sm:$0x3] }
  0x1b   :  { %v274_v3 = vperm.slane %v272_v2, 0  ;;  %v275_v5 = vperm.slane %v272_v2, 1  ;;  %v555_v38 = vld [vmem:[%s831_s10] ss:$0 sm:$0xff]  ;;  %s690_s10 = smov [#allocation8]  }
  0x1c   :  { %188 = vmatpush.bf16.msra.mxu1 %v522_v6  ;;  %340 = vmatpush.bf16.msrb.mxu0 %v507_v44  ;;  %s417_s18 = sshll.u32 %s690_s10, 4  ;;  %s418_s18 = int_to_ptr.vmem [resolvable:$true] %s417_s18 }
  0x1d   :  { %326 = vmatpush.bf16.msra.mxu3 %v503_v42 }
  0x1e   :  { %254 = vmatpush.bf16.msra.mxu2 %v526_v19 }
  0x1f   :  { %466 = vmatmul.msk.bf16.vlgmr.msra.gmra.mxu1 %vm177_vm1, %v521_v7 }
  0x20   :  { %341 = vmatpush.bf16.msrb.mxu0 %v499_v50 }
  0x21   :  { %327 = vmatpush.bf16.msra.mxu3 %v495_v48 }
  0x24   :  { %342 = vmatpush.bf16.msrb.mxu0 %v491_v56 }
  0x25   :  { %328 = vmatpush.bf16.msra.mxu3 %v487_v54 }
  0x94   :  { %v127_v20 = vpop.f32.mrf.mxu0 }
  0x95   :  { %v128_v23 = vadd.f32 %v553_v21, %v127_v20 }
  0x97   :  { %v132_v26 = vmax.f32 %v128_v23, 0.0 }
  0x9c   :  { %v190_v11 = vpop.f32.mrf.mxu1  ;;  %v129_v22 = vpop.f32.mrf.mxu0 }
  0x9d   :  { %v191_v13 = vadd.f32 %v552_v12, %v190_v11  ;;  %v130_v24 = vadd.f32 %v553_v21, %v129_v22 }
  0x9f   :  { %v195_v16 = vmax.f32 %v191_v13, 0.0  ;;  %v133_v27 = vmax.f32 %v130_v24, 0.0 }
  0xa4   :  { %v192_v14 = vpop.f32.mrf.mxu1 }
  0xa5   :  { %v193_v15 = vadd.f32 %v552_v12, %v192_v14 }
  0xa7   :  { %v196_v17 = vmax.f32 %v193_v15, 0.0 }
  0xa9   :  { %v547_v18 = vpack.i.bf16 %v196_v17, %v195_v16 }
  0xab   :  { %548 = vrot.lane.b32.xlu0 %v547_v18, %s689_s1 }
 0x11d   :  { %v549_v25 = vpop.permute.xlu0 %548 }
 0x11e   :  { %v551_v28 = vunpack.i.h.bf16 %v549_v25  ;;  %v550_v29 = vunpack.i.l.bf16 %v549_v25 }
 0x120   :  { %v205_v30 = vsel %vm114_vm0, %v132_v26, %v550_v29  ;;  %v206_v31 = vsel %vm114_vm0, %v133_v27, %v551_v28 }
 0x121   :  { %v207_v32 = vpack.c.bf16 %v206_v31, %v205_v30 }
 0x123   :  { %483 = vmatmul.msk.bf16.vlgmr.msra.gmra.mxu2 %vm177_vm1, %v207_v32 }
 0x1a6   :  { %v256_v57 = vpop.f32.mrf.mxu2 }
 0x1a7   :  { %v257_v59 = vadd.f32 %v554_v58, %v256_v57 }
 0x1a9   :  { %v261_v62 = vmax.f32 %v257_v59, 0.0 }
 0x1ae   :  { %v258_v60 = vpop.f32.mrf.mxu2 }
 0x1af   :  { %v259_v61 = vadd.f32 %v554_v58, %v258_v60 }
 0x1b1   :  { %v262_v63 = vmax.f32 %v259_v61, 0.0 }
 0x1b3   :  { %v263_v0 = vpack.c.bf16 %v262_v63, %v261_v62 }
 0x1b5   :  { %516 = vmatmul.msk.bf16.vlgmr.msra.gmra.mxu3 %vm177_vm1, %v263_v0  ;;  %517 = vmatmul.msk.bf16.vlgmr.msrb.gmra.mxu0 %vm177_vm1, %v263_v0 }
 0x232   :  { %v344_v1 = vpop.f32.mrf.mxu0 }
 0x233   :  { %v345_v11 = vadd.f32 %v344_v1, %v275_v5 }
 0x238   :  { %v330_v4 = vpop.f32.mrf.mxu3 }
 0x239   :  { %v331_v6 = vadd.f32 %v330_v4, %v274_v3 }
 0x23a   :  { %v346_v7 = vpop.f32.mrf.mxu0 }
 0x23b   :  { %v347_v8 = vadd.f32 %v346_v7, %v275_v5  ;;  %349 = vmax.xlane.f32.xlu0 %v331_v6 }
 0x23d   :  { %369 = vmax.xlane.f32.xlu2 %v347_v8 }
 0x240   :  { %v332_v9 = vpop.f32.mrf.mxu3 }
 0x241   :  { %v333_v10 = vadd.f32 %v332_v9, %v274_v3 }
 0x243   :  { %351 = vmax.xlane.f32.xlu1 %v333_v10 }
 0x24b   :  { %367 = vmax.xlane.f32.xlu1 %v345_v11 }
 0x2ae   :  { %v350_v12 = vpop.xlane.xlu0 %349 }
 0x2af   :  { %v353_v13 = vsub.f32 %v331_v6, %v350_v12 }
 0x2b0   :  { %v370_v16 = vpop.xlane.xlu2 %369 }
 0x2b1   :  { %v355_v14 = vmul.f32 1.442695, %v353_v13  ;;  %v372_v20 = vsub.f32 %v347_v8, %v370_v16 }
 0x2b3   :  { %556 = vpow2.f32 %v355_v14  ;;  %v375_v21 = vmul.f32 1.442695, %v372_v20 }
 0x2b6   :  { %v352_v15 = vpop.xlane.xlu1 %351 }
 0x2b7   :  { %v354_v17 = vsub.f32 %v333_v10, %v352_v15 }
 0x2b9   :  { %v557_v18 = vpop.eup %556  ;;  %v357_v19 = vmul.f32 1.442695, %v354_v17 }
 0x2ba   :  { %359 = vadd.xlane.f32.xlu2 %v557_v18 }
 0x2bb   :  { %558 = vpow2.f32 %v357_v19 }
 0x2bc   :  { %560 = vpow2.f32 %v375_v21 }
 0x2be   :  { %v368_v22 = vpop.xlane.xlu1 %367 }
 0x2bf   :  { %v371_v23 = vsub.f32 %v345_v11, %v368_v22 }
 0x2c1   :  { %v559_v24 = vpop.eup %558  ;;  %v373_v25 = vmul.f32 1.442695, %v371_v23 }
 0x2c2   :  { %361 = vadd.xlane.f32.xlu1 %v559_v24  ;;  %v561_v26 = vpop.eup %560 }
 0x2c3   :  { %562 = vpow2.f32 %v373_v25 }
 0x2c9   :  { %v563_v27 = vpop.eup %562 }
 0x2ca   :  { %379 = vadd.xlane.f32.xlu1 %v561_v26  ;;  %377 = vadd.xlane.f32.xlu2 %v563_v27 }
 0x32d   :  { %v360_v28 = vpop.xlane.xlu2 %359 }
 0x335   :  { %v362_v29 = vpop.xlane.xlu1 %361 }
 0x336   :  { %564 = vrcp.f32 %v362_v29 }
 0x337   :  { %566 = vrcp.f32 %v360_v28 }
 0x33c   :  { %v565_v32 = vpop.eup %564 }
 0x33d   :  { %v380_v30 = vpop.xlane.xlu1 %379  ;;  %v378_v31 = vpop.xlane.xlu2 %377  ;;  %v366_v36 = vmul.f32 %v565_v32, %v559_v24 }
 0x33e   :  { %568 = vrcp.f32 %v380_v30  ;;  %v567_v33 = vpop.eup %566 }
 0x33f   :  { %570 = vrcp.f32 %v378_v31  ;;  %v365_v39 = vmul.f32 %v567_v33, %v557_v18 }
 0x344   :  { %v569_v34 = vpop.eup %568 }
 0x345   :  { %v571_v35 = vpop.eup %570  ;;  %v384_v37 = vmul.f32 %v569_v34, %v561_v26 }
 0x346   :  { %v383_v40 = vmul.f32 %v571_v35, %v563_v27 }
 0x347   :  { %v386_v41 = vadd.f32 %v384_v37, %v366_v36 }
 0x348   :  { %v385_v42 = vadd.f32 %v383_v40, %v365_v39 }
 0x349   :  { %v392_v43 = vadd.f32 %v555_v38, %v386_v41 }
 0x34a   :  { %v391_v44 = vadd.f32 %v555_v38, %v385_v42 }
 0x34b   :  { %395 = vmax.xlane.f32.xlu1 %v392_v43 }
 0x34c   :  { %393 = vmax.xlane.f32.xlu2 %v391_v44 }
 0x3be   :  { %v396_v45 = vpop.xlane.xlu1 %395 }
 0x3bf   :  { %v398_v46 = vsub.f32 %v392_v43, %v396_v45  ;;  %v394_v47 = vpop.xlane.xlu2 %393 }
 0x3c0   :  { %v397_v48 = vsub.f32 %v391_v44, %v394_v47 }
 0x3c1   :  { %v401_v49 = vmul.f32 1.442695, %v398_v46 }
 0x3c2   :  { %v399_v50 = vmul.f32 1.442695, %v397_v48 }
 0x3c3   :  { %572 = vpow2.f32 %v401_v49 }
 0x3c4   :  { %574 = vpow2.f32 %v399_v50 }
 0x3c9   :  { %v573_v51 = vpop.eup %572 }
 0x3ca   :  { %v575_v52 = vpop.eup %574  ;;  %405 = vadd.xlane.f32.xlu1 %v573_v51 }
 0x3cb   :  { %403 = vadd.xlane.f32.xlu2 %v575_v52 }
 0x43d   :  { %v406_v53 = vpop.xlane.xlu1 %405 }
 0x43e   :  { %576 = vrcp.f32 %v406_v53  ;;  %v404_v54 = vpop.xlane.xlu2 %403 }
 0x43f   :  { %578 = vrcp.f32 %v404_v54 }
 0x444   :  { %v577_v55 = vpop.eup %576 }
 0x445   :  { %v579_v56 = vpop.eup %578  ;;  %v410_v57 = vmul.f32 %v577_v55, %v573_v51 }
 0x446   :  { %v409_v58 = vmul.f32 %v579_v56, %v575_v52 }
 0x447   :  { %412 = vst [vmem:[#allocation8 + $0x8] sm:$0xff] %v410_v57 }
 0x448   :  { %411 = vst [vmem:[#allocation8] sm:$0xff] %v409_v58 }
 0x449   :  { %425 = dma.vmem_to_hbm [thread:$0]  %s418_s18, 256, %s420_s21, [#allocation4], %s687_s14, %s687_s14, %s688_s15  }
 0x44a   :  { %680 = dma.done.wait [#allocation4], 256  }
 0x44b   :  { %681 = vsyncadd [#allocation4], 4294967040 }
 0x44c   :  { %430 = vsyncpa [#allocation3], 1 }
 0x44d   :  { %431 = vsyncpa [#allocation6], 1 }
 0x44e   :  { %432 = vsyncpa [#allocation4], 1 }

</bundles_post_ra>
